<compile_context>
chip_gen: v7x
topology: tpu7x:2x2x1
jax: 0.10.0
libtpu: 0.0.40
codegen_flags: <defaults>
</compile_context>

<pallas_src>
import jax
import jax.numpy as jnp
from jax.experimental import pallas as pl
from jax.experimental.pallas import tpu as pltpu


# ---------------------------------------------------------------------------
# Kernels
# ---------------------------------------------------------------------------

def _perturbation_fused_kernel(sig_ref, x_ref, pp_ref, pm_ref):
    """Fast path: whole x resident in VMEM, global mean fused in-kernel.

    sig_ref: (1, F) f32; x_ref / pp_ref / pm_ref: (B, F) in x's dtype.
    """
    x = x_ref[...].astype(jnp.float32)
    ave = jnp.mean(x)                        # global mean, fused (one less HBM pass)
    t = sig_ref[...] * (x - ave)             # (1, F) broadcasts over batch rows
    pp_ref[...] = (ave + t).astype(pp_ref.dtype)
    pm_ref[...] = (x - t).astype(pm_ref.dtype)


def _perturbation_tiled_kernel(ave_ref, sig_ref, x_ref, pp_ref, pm_ref):
    """Streaming path.

    ave_ref: (1,) f32 in SMEM (global mean); sig_ref: (1, tile_f) f32;
    x_ref / pp_ref / pm_ref: (tile_b, tile_f) in x's dtype.
    """
    ave = ave_ref[0]
    x = x_ref[...].astype(jnp.float32)
    t = sig_ref[...] * (x - ave)
    pp_ref[...] = (ave + t).astype(pp_ref.dtype)
    pm_ref[...] = (x - t).astype(pm_ref.dtype)


# ---------------------------------------------------------------------------
# Tiling policy
# ---------------------------------------------------------------------------

# 3 streamed arrays (x, p_p, p_m) x 2 pipeline buffers of live blocks.
_LIVE_BLOCK_BUDGET = 18 * 1024 * 1024
_PER_ARRAY_TILE_BUDGET = _LIVE_BLOCK_BUDGET // 6          # ~3 MiB per tile
_VMEM_LIMIT_BYTES = 40 * 1024 * 1024                      # < v7x 64 MiB physical
# x + p_p + p_m comfortably VMEM-resident on every generation -> fused path.
_FAST_PATH_BYTES = 8 * 1024 * 1024


def _round_up(n, m):
    return (n + m - 1) // m * m


def _sublane_multiple(dtype):
    return {4: 8, 2: 16, 1: 32}.get(jnp.dtype(dtype).itemsize, 8)


def _choose_tiles(B, F, dtype):
    itemsize = jnp.dtype(dtype).itemsize
    sub = _sublane_multiple(dtype)

    # Feature tile: keep the full (unpadded) F when at least `sub` rows of it
    # fit the per-array budget; otherwise fall back to a 128-multiple tile.
    if sub * F * itemsize <= _PER_ARRAY_TILE_BUDGET:
        tile_f = F
    else:
        tile_f = (_PER_ARRAY_TILE_BUDGET // (sub * itemsize)) // 128 * 128
        tile_f = max(128, min(2048, tile_f))

    # Batch tile: as many rows as fit the per-array budget, but keep >= ~4 grid
    # steps (when B allows) so the parallel axes occupy both v7x TensorCores.
    rows = max(sub, _PER_ARRAY_TILE_BUDGET // max(1, tile_f * itemsize))
    rows = min(rows, max(sub, _round_up(pl.cdiv(B, 4), sub)))
    tile_b = max(sub, rows // sub * sub)
    return tile_b, tile_f


# ---------------------------------------------------------------------------
# Wrapper
# ---------------------------------------------------------------------------

def perturbation_pallas(x, sigma_param, *, tile_b=None, tile_f=None,
                        force_tiled=False):
    """x: (B, F); sigma_param: (F,) -> (p_p (B,F), p_m (B,F), sigma (F,))."""
    B, F = x.shape
    dtype = x.dtype
    itemsize = jnp.dtype(dtype).itemsize
    sub = _sublane_multiple(dtype)

    # sigmoid computed once, outside any grid loop (EUP work not repeated).
    sigma_f32 = jax.nn.sigmoid(sigma_param.astype(jnp.float32))
    sig_row = sigma_f32.reshape(1, F)
    sigma_out = sigma_f32.astype(sigma_param.dtype)

    # -------- Fused fast path: everything VMEM-resident, mean in-kernel. -----
    if not force_tiled and 3 * B * F * itemsize <= _FAST_PATH_BYTES:
        pp, pm = pl.pallas_call(
            _perturbation_fused_kernel,
            out_shape=(
                jax.ShapeDtypeStruct((B, F), dtype),
                jax.ShapeDtypeStruct((B, F), dtype),
            ),
        )(sig_row, x)
        return pp, pm, sigma_out

    # -------- Tiled streaming path. ------------------------------------------
    # Global mean over the (unpadded) elements, passed as an SMEM scalar.
    ave = jnp.mean(x, dtype=jnp.float32).reshape(1)

    tb, tf = _choose_tiles(B, F, dtype)
    if tile_b is not None:
        tb = max(sub, (int(tile_b) // sub) * sub)
    if tile_f is not None:
        tf = F if int(tile_f) >= F else max(128, (int(tile_f) // 128) * 128)
    # Clamping to the full dim is always legal (block dim == array dim).
    tb = min(tb, B)
    tf = min(tf, F)

    grid = (pl.cdiv(B, tb), pl.cdiv(F, tf))   # ragged tail blocks are masked

    pp, pm = pl.pallas_call(
        _perturbation_tiled_kernel,
        grid=grid,
        in_specs=[
            pl.BlockSpec(memory_space=pltpu.MemorySpace.SMEM),      # ave scalar
            pl.BlockSpec((1, tf), lambda i, j: (0, j)),             # sigma row
            pl.BlockSpec((tb, tf), lambda i, j: (i, j)),            # x tile
        ],
        out_specs=(
            pl.BlockSpec((tb, tf), lambda i, j: (i, j)),
            pl.BlockSpec((tb, tf), lambda i, j: (i, j)),
        ),
        out_shape=(
            jax.ShapeDtypeStruct((B, F), dtype),
            jax.ShapeDtypeStruct((B, F), dtype),
        ),
        compiler_params=pltpu.CompilerParams(
            dimension_semantics=("parallel", "parallel"),
            vmem_limit_bytes=_VMEM_LIMIT_BYTES,
        ),
    )(ave, sig_row, x)

    return pp, pm, sigma_out


def _reference(x, sigma_param):
    ave = jnp.mean(x)
    sig = jax.nn.sigmoid(sigma_param)
    p_p = sig * x + (1.0 - sig) * ave
    p_m = sig * ave + (1.0 - sig) * x
    return p_p, p_m, sig


# ---------------------------------------------------------------------------
# Self-test
# ---------------------------------------------------------------------------

if __name__ == "__main__":
    key = jax.random.PRNGKey(0)
    k1, k2, k3 = jax.random.split(key, 3)

    # --- Case 1: module's natural size (batch=8, n_feat=32) -> fused fast path.
    B, F = 8, 32
    x = jax.random.normal(k1, (B, F), dtype=jnp.float32)
    sigma_param = jnp.ones((F,), dtype=jnp.float32) / 2.0   # nn.Parameter(ones/2)

    p_p, p_m, sigma = perturbation_pallas(x, sigma_param)
    jax.block_until_ready((p_p, p_m, sigma))

    r_pp, r_pm, r_sig = _reference(x, sigma_param)
    assert p_p.shape == (B, F) and p_m.shape == (B, F) and sigma.shape == (F,)
    assert jnp.allclose(p_p, r_pp, atol=1e-5, rtol=1e-5)
    assert jnp.allclose(p_m, r_pm, atol=1e-5, rtol=1e-5)
    assert jnp.allclose(sigma, r_sig, atol=1e-6, rtol=1e-6)

    # --- Case 2: tiled path, unpadded F=200 blocks (block last dim == full dim)
    # and a ragged batch tail (B=20, tile_b=8 -> grid_b=3, last block masked).
    B2, F2 = 20, 200
    x2 = jax.random.normal(k2, (B2, F2), dtype=jnp.float32)
    sp2 = 0.1 * jax.random.normal(k3, (F2,), dtype=jnp.float32)

    p_p2, p_m2, sigma2 = perturbation_pallas(x2, sp2, tile_b=8, force_tiled=True)
    jax.block_until_ready((p_p2, p_m2, sigma2))

    r_pp2, r_pm2, r_sig2 = _reference(x2, sp2)
    assert jnp.allclose(p_p2, r_pp2, atol=1e-5, rtol=1e-5)
    assert jnp.allclose(p_m2, r_pm2, atol=1e-5, rtol=1e-5)
    assert jnp.allclose(sigma2, r_sig2, atol=1e-6, rtol=1e-6)

    # --- Case 3: tiled path with a feature grid axis (tile_f=128, F=200 ->
    # grid_f=2 with a masked ragged lane tail), plus the ragged batch tail.
    p_p3, p_m3, sigma3 = perturbation_pallas(x2, sp2, tile_b=8, tile_f=128,
                                             force_tiled=True)
    jax.block_until_ready((p_p3, p_m3, sigma3))

    assert jnp.allclose(p_p3, r_pp2, atol=1e-5, rtol=1e-5)
    assert jnp.allclose(p_m3, r_pm2, atol=1e-5, rtol=1e-5)
    assert jnp.allclose(sigma3, r_sig2, atol=1e-6, rtol=1e-6)

    print("KERNEL_OK")
</pallas_src>

<mosaic_0001>
module attributes {stable_mosaic.version = 11 : i64} {
  func.func @_perturbation_fused_kernel(%arg0: memref<1x32xf32, #tpu.memory_space<vmem>>, %arg1: memref<8x32xf32, #tpu.memory_space<vmem>>, %arg2: memref<8x32xf32, #tpu.memory_space<vmem>>, %arg3: memref<8x32xf32, #tpu.memory_space<vmem>>) attributes {dimension_semantics = [], scalar_prefetch = 0 : i64, scratch_operands = 0 : i64, tpu.core_type = #tpu.core_type<tc>} {
    %c0 = arith.constant 0 : index
    %c0_0 = arith.constant 0 : index
    %0 = vector.load %arg1[%c0, %c0_0] : memref<8x32xf32, #tpu.memory_space<vmem>>, vector<8x32xf32>
    %1 = vector.shape_cast %0 : vector<8x32xf32> to vector<1x8x32xf32>
    %cst = arith.constant dense<0.000000e+00> : vector<1xf32>
    %2 = vector.multi_reduction <add>, %1, %cst [1, 2] : vector<1x8x32xf32> to vector<1xf32>
    %3 = vector.shape_cast %2 : vector<1xf32> to vector<1x1x1xf32>
    %4 = vector.extract %3[0, 0, 0] : f32 from vector<1x1x1xf32>
    %cst_1 = arith.constant 2.560000e+02 : f32
    %5 = arith.divf %4, %cst_1 : f32
    %c0_2 = arith.constant 0 : index
    %c0_3 = arith.constant 0 : index
    %6 = vector.load %arg0[%c0_2, %c0_3] : memref<1x32xf32, #tpu.memory_space<vmem>>, vector<1x32xf32>
    %7 = vector.broadcast %5 : f32 to vector<8x32xf32>
    %8 = arith.subf %0, %7 : vector<8x32xf32>
    %9 = vector.broadcast %6 : vector<1x32xf32> to vector<8x32xf32>
    %10 = arith.mulf %9, %8 : vector<8x32xf32>
    %11 = vector.broadcast %5 : f32 to vector<8x32xf32>
    %12 = arith.addf %11, %10 : vector<8x32xf32>
    %c0_4 = arith.constant 0 : index
    %c0_5 = arith.constant 0 : index
    %13 = vector.load %arg2[%c0_4, %c0_5] : memref<8x32xf32, #tpu.memory_space<vmem>>, vector<8x32xf32>
    tpu.vector_store %arg2[%c0_4, %c0_5], %12 {strides = array<i32>} : memref<8x32xf32, #tpu.memory_space<vmem>>, vector<8x32xf32>,
    %14 = arith.subf %0, %10 : vector<8x32xf32>
    %c0_6 = arith.constant 0 : index
    %c0_7 = arith.constant 0 : index
    %15 = vector.load %arg3[%c0_6, %c0_7] : memref<8x32xf32, #tpu.memory_space<vmem>>, vector<8x32xf32>
    tpu.vector_store %arg3[%c0_6, %c0_7], %14 {strides = array<i32>} : memref<8x32xf32, #tpu.memory_space<vmem>>, vector<8x32xf32>,
    return
  }
}

</mosaic_0001>

<bundles_post_ra>
// kernel: tpu_custom_call.1
= control target key start
LH: loop header
LB: loop body
LE: loop exit
PB: predicated region body
PF: predicated region fallthrough
CT: control target
= control target key end

     0   :  { %9 = vsyncpa [#allocation3], 0  ;;  %s276_s0 = inlined_call_operand.hbm [shape: f32[1,32], index: 0, kind: input, shape index: {}]   ;;  %s277_s1 = inlined_call_operand.hbm [shape: f32[8,32], index: 1, kind: input, shape index: {}]   ;;  %s278_s2 = inlined_call_operand.hbm [shape: f32[8,32], index: 2, kind: output, shape index: {0}]   ;;  %s279_s3 = inlined_call_operand.hbm [shape: f32[8,32], index: 3, kind: output, shape index: {1}]  }
   0x1   :  { %10 = vsyncpa [#allocation6], 0 }
   0x2   :  { %11 = vsyncpa [#allocation4], 0 }
   0x3   :  { %12 = vsyncpa [#allocation9], 0  ;;  %s201_s12 = smov [#allocation2]   ;;  %s202_s14 = smov [#allocation5]  }
   0x4   :  { %s19_s13 = sshll.u32 %s201_s12, 4  ;;  %s29_s15 = sshll.u32 %s202_s14, 4  ;;  %s20_s13 = int_to_ptr.vmem [resolvable:$true] %s19_s13  ;;  %s30_s15 = int_to_ptr.vmem [resolvable:$true] %s29_s15 }
   0x5   :  { %s105_s18 = scalar_lea.hbm %s276_s0, 16 }
   0x6   :  { %p106_p0 = scmp.ne.s32.totalorder %s276_s0, %s105_s18  ;;  %p109_p1 = scmp.lt.u32.totalorder %s105_s18, %s276_s0 }
   0x8   :  { %p111_p2 = pnand %p109_p1, %p106_p0 }
   0xa   :  { %114 = shalt.err (!%p111_p2)
}
   0xb   :  { %s115_s23 = scalar_lea.vmem %s20_s13, 16  ;;  %s119_s24 = scalar_lea.vmem %s20_s13, 32 }
   0xc   :  { %p116_p3 = scmp.ne.s32.totalorder %s20_s13, %s115_s23  ;;  %p120_p4 = scmp.lt.s32.totalorder %s20_s13, %s20_s13 }
   0xd   :  { %p121_p5 = scmp.lt.s32.totalorder %s119_s24, %s115_s23 }
   0xf   :  { %p122_p6 = por %p121_p5, %p120_p4 }
  0x11   :  { %p123_p7 = pnand %p122_p6, %p116_p3 }
  0x13   :  { %126 = shalt.err (!%p123_p7)
}
  0x14   :  { %22 = dma.hbm_to_vmem [thread:$0]  %s276_s0, 16, %s20_s13, [#allocation3]  }
  0x15   :  { %s127_s29 = scalar_lea.hbm %s277_s1, 128 }
  0x16   :  { %p128_p8 = scmp.ne.s32.totalorder %s277_s1, %s127_s29  ;;  %p131_p9 = scmp.lt.u32.totalorder %s127_s29, %s277_s1 }
  0x18   :  { %p133_p10 = pnand %p131_p9, %p128_p8 }
  0x1a   :  { %136 = shalt.err (!%p133_p10)
}
  0x1b   :  { %s137_s7 = scalar_lea.vmem %s30_s15, 128  ;;  %p142_p12 = scmp.lt.s32.totalorder %s30_s15, %s30_s15 }
  0x1c   :  { %p138_p11 = scmp.ne.s32.totalorder %s30_s15, %s137_s7  ;;  %p143_p13 = scmp.lt.s32.totalorder %s137_s7, %s137_s7 }
  0x1e   :  { %p144_p0 = por %p143_p13, %p142_p12 }
  0x20   :  { %p145_p1 = pnand %p144_p0, %p138_p11 }
  0x22   :  { %148 = shalt.err (!%p145_p1)
}
  0x23   :  { %32 = dma.hbm_to_vmem [thread:$0]  %s277_s1, 128, %s30_s15, [#allocation6]  }
  0x24   :  { %193 = dma.done.wait [#allocation3], 16  }
  0x25   :  { %194 = vsyncadd [#allocation3], 4294967280 }
  0x26   :  { %195 = dma.done.wait [#allocation6], 128  }
  0x27   :  { %196 = vsyncadd [#allocation6], 4294967168  ;;  %vm40_vm0 = vcmask 261120   ;;  %v39_v0 = vld [vmem:[#allocation5] sm:$0xff]  ;;  %v98_v9 = vld [vmem:[#allocation2] ss:$0 sm:$0xff] }
  0x28   :  { %v41_v1 = vsel %vm40_vm0, %v39_v0, 0.0  ;;  %s203_s1 = smov [#allocation7]   ;;  %s204_s12 = smov [#allocation8]  }
  0x29   :  { %42 = vadd.xlane.f32.xlu0 %v41_v1  ;;  %s74_s11 = sshll.u32 %s203_s1, 4  ;;  %s84_s13 = sshll.u32 %s204_s12, 4  ;;  %s75_s11 = int_to_ptr.vmem [resolvable:$true] %s74_s11  ;;  %s85_s13 = int_to_ptr.vmem [resolvable:$true] %s84_s13 }
  0x2a   :  { %s149_s14 = scalar_lea.vmem %s75_s11, 128  ;;  %p154_p3 = scmp.lt.s32.totalorder %s75_s11, %s75_s11 }
  0x2b   :  { %p150_p2 = scmp.ne.s32.totalorder %s75_s11, %s149_s14  ;;  %p155_p4 = scmp.lt.s32.totalorder %s149_s14, %s149_s14 }
  0x2d   :  { %p156_p5 = por %p155_p4, %p154_p3 }
  0x2f   :  { %p157_p6 = pnand %p156_p5, %p150_p2 }
  0xb6   :  { %v43_v2 = vpop.xlane.xlu0 %42 }
  0xb7   :  { %v44_v3 = vrot.slane %v43_v2, 4 }
  0xb9   :  { %v45_v4 = vadd.f32 %v44_v3, %v43_v2 }
  0xbb   :  { %v46_v5 = vrot.slane %v45_v4, 2 }
  0xbd   :  { %v47_v6 = vadd.f32 %v46_v5, %v45_v4 }
  0xbf   :  { %v48_v7 = vrot.slane %v47_v6, 1 }
  0xc1   :  { %v49_v8 = vadd.f32 %v48_v7, %v47_v6 }
  0xc3   :  { %99 = vpush %v49_v8 }
  0xf4   :  { %s100_s9 = spop %99 }
  0xf5   :  { %s53_s10 = smul.f32 0.00390625, %s100_s9 }
  0xf7   :  { %v55_v10 = vstv %s53_s10 }
  0xf8   :  { %v56_v11 = vsub.f32 %v39_v0, %v55_v10 }
  0xfa   :  { %v63_v12 = vmul.f32 %v98_v9, %v56_v11 }
  0xfc   :  { %v64_v13 = vadd.f32 %v63_v12, %v55_v10  ;;  %v66_v14 = vsub.f32 %v39_v0, %v63_v12 }
  0xfe   :  { %65 = vst.msk [vmem:[#allocation7] sm:$0xff] %vm40_vm0, %v64_v13  ;;  %67 = vst.msk [vmem:[#allocation8] sm:$0xff] %vm40_vm0, %v66_v14 }
  0xff   :  { %160 = shalt.err (!%p157_p6)
}
 0x100   :  { %s161_s17 = scalar_lea.hbm %s278_s2, 128 }
 0x101   :  { %p162_p7 = scmp.ne.s32.totalorder %s278_s2, %s161_s17  ;;  %p165_p8 = scmp.lt.u32.totalorder %s161_s17, %s278_s2 }
 0x103   :  { %p167_p9 = pnand %p165_p8, %p162_p7 }
 0x105   :  { %170 = shalt.err (!%p167_p9)
}
 0x106   :  { %77 = dma.vmem_to_hbm [thread:$0]  %s75_s11, 128, %s278_s2, [#allocation4]  }
 0x107   :  { %s171_s24 = scalar_lea.vmem %s85_s13, 128  ;;  %p176_p11 = scmp.lt.s32.totalorder %s85_s13, %s85_s13 }
 0x108   :  { %p172_p10 = scmp.ne.s32.totalorder %s85_s13, %s171_s24  ;;  %p177_p12 = scmp.lt.s32.totalorder %s171_s24, %s171_s24 }
 0x10a   :  { %p178_p13 = por %p177_p12, %p176_p11 }
 0x10c   :  { %p179_p0 = pnand %p178_p13, %p172_p10 }
 0x10e   :  { %182 = shalt.err (!%p179_p0)
}
 0x10f   :  { %s183_s27 = scalar_lea.hbm %s279_s3, 128 }
 0x110   :  { %p184_p1 = scmp.ne.s32.totalorder %s279_s3, %s183_s27  ;;  %p187_p2 = scmp.lt.u32.totalorder %s183_s27, %s279_s3 }
 0x112   :  { %p189_p3 = pnand %p187_p2, %p184_p1 }
 0x114   :  { %192 = shalt.err (!%p189_p3)
}
 0x115   :  { %87 = dma.vmem_to_hbm [thread:$0]  %s85_s13, 128, %s279_s3, [#allocation9]  }
 0x116   :  { %197 = dma.done.wait [#allocation4], 128  }
 0x117   :  { %198 = vsyncadd [#allocation4], 4294967168 }
 0x118   :  { %199 = dma.done.wait [#allocation9], 128  }
 0x119   :  { %200 = vsyncadd [#allocation9], 4294967168 }
 0x11a   :  { %94 = vsyncpa [#allocation3], 1 }
 0x11b   :  { %95 = vsyncpa [#allocation6], 1 }
 0x11c   :  { %96 = vsyncpa [#allocation4], 1 }
 0x11d   :  { %97 = vsyncpa [#allocation9], 1 }

</bundles_post_ra>
